<compile_context>
chip_gen: v5e
topology: v5e:2x2
jax: 0.10.0
libtpu: 0.0.40
codegen_flags: <defaults>
</compile_context>

<pallas_src>
import functools

import jax
import jax.numpy as jnp
from jax import lax
from jax.experimental import pallas as pl
from jax.experimental.pallas import tpu as pltpu

_NEG_SLOPE = 0.2

# kernel tap index kh (or kw) -> (row/col parity of the padded input, block offset)
_PHASE = ((0, 0), (1, 0), (0, 1))


def _round_up(x, m):
    return ((x + m - 1) // m) * m


def _vmem_limit_bytes():
    """Generation-aware scoped-VMEM limit (leave headroom for compiler scratch)."""
    cap = 128 * 1024 * 1024
    try:
        cap = int(pltpu.get_tpu_info().vmem_capacity_bytes)
    except Exception:
        pass
    # ~5/8 of per-core VMEM: 80 MiB on v5e/v6e (128 MiB), 40 MiB on v7x (64 MiB).
    return min((cap * 5) // 8, 100 * 1024 * 1024)


# --------------------------------------------------------------------------
# XLA-side relayout: pad + space-to-depth + flatten (single fused copy).
# --------------------------------------------------------------------------
def _space_to_depth_flat(x_nchw, Ho, Wo, Mp):
    """(N, Cin, H, W) -> (N, 4, Cin, Mp) where phase = p*2 + q and
    xs[n, p*2+q, c, a*(Wo+1)+b] == x_padded[n, c, 2a+p, 2b+q]  (pad=1 top/left,
    zero pad bottom/right up to 2*(Ho+1) x 2*(Wo+1)); lane axis zero-padded to Mp."""
    N, Cin, H, W = x_nchw.shape
    Hp, Wp = 2 * (Ho + 1), 2 * (Wo + 1)
    xp = jnp.pad(x_nchw, ((0, 0), (0, 0), (1, Hp - H - 1), (1, Wp - W - 1)))
    xs = xp.reshape(N, Cin, Ho + 1, 2, Wo + 1, 2).transpose(0, 3, 5, 1, 2, 4)
    xs = xs.reshape(N, 4, Cin, (Ho + 1) * (Wo + 1))
    return jnp.pad(xs, ((0, 0), (0, 0), (0, 0), (0, Mp - (Ho + 1) * (Wo + 1))))


# --------------------------------------------------------------------------
# Fused conv(3x3, stride 2, pad 1) + bias + LeakyReLU kernel.
# --------------------------------------------------------------------------
def _make_conv_kernel(Cin, Cout, Wo, Mp):
    # Precompute (tap index, phase index, lane offset) for the 9 taps.
    taps = []
    for kh in range(3):
        p, dr = _PHASE[kh]
        for kw in range(3):
            q, dc = _PHASE[kw]
            taps.append((kh * 3 + kw, p * 2 + q, dr * (Wo + 1) + dc))

    def kernel(x_ref, w_ref, b_ref, o_ref):
        # x_ref: (4, Cin, Mp)   w_ref: (9, Cout, Cin)   b_ref: (Cout, 1)
        # o_ref: (Cout, Mp)     (lane-dense, NCHW order, garbage lanes sliced in XLA)
        acc = jnp.zeros((Cout, Mp), jnp.float32)
        for t, ph, off in taps:
            xv = x_ref[ph]                                   # (Cin, Mp)
            if off:
                # bring element (m + off) to lane m; wrapped lanes land past the
                # meaningful output range and are sliced off downstream.
                xv = pltpu.roll(xv, Mp - off, axis=1)        # XLU lane rotate
            w_t = w_ref[t]                                   # (Cout, Cin)
            if Cin == 1:
                # degenerate contraction -> VPU broadcast FMA (f32 accumulate)
                acc = acc + w_t.astype(jnp.float32) * xv.astype(jnp.float32)
            else:
                acc = acc + jnp.dot(w_t, xv, preferred_element_type=jnp.float32)
        y = acc + b_ref[...]
        y = jnp.where(y >= 0, y, _NEG_SLOPE * y)
        o_ref[...] = y.astype(o_ref.dtype)

    return kernel


def conv2d_s2_lrelu_pallas(x_nchw, w_oihw, b, *, use_bf16=True, out_dtype=None):
    """Conv2d(k=3, stride=2, pad=1) + LeakyReLU(0.2), PyTorch semantics (NCHW)."""
    N, Cin, H, W = x_nchw.shape
    Cout = w_oihw.shape[0]
    Ho = (H - 1) // 2 + 1
    Wo = (W - 1) // 2 + 1
    # lane extent: must cover all tap reads ((Ho+1)*(Wo+1) elements) and be 128-aligned
    Mp = _round_up((Ho + 1) * (Wo + 1) + 1, 128)
    Mo = Ho * (Wo + 1)                       # meaningful output lanes (incl. garbage col)

    feed_dtype = jnp.bfloat16 if use_bf16 else x_nchw.dtype
    if out_dtype is None:
        out_dtype = jnp.bfloat16 if use_bf16 else x_nchw.dtype

    xs = _space_to_depth_flat(x_nchw.astype(feed_dtype), Ho, Wo, Mp)      # (N,4,Cin,Mp)
    wt = jnp.transpose(w_oihw, (2, 3, 0, 1)).reshape(9, Cout, Cin).astype(feed_dtype)
    bb = b.reshape(Cout, 1).astype(jnp.float32)

    kernel = _make_conv_kernel(Cin, Cout, Wo, Mp)

    out = pl.pallas_call(
        kernel,
        out_shape=jax.ShapeDtypeStruct((N, Cout, Mp), out_dtype),
        grid_spec=pltpu.PrefetchScalarGridSpec(
            num_scalar_prefetch=0,
            grid=(N,),
            in_specs=[
                pl.BlockSpec((None, 4, Cin, Mp), lambda n: (n, 0, 0, 0)),
                pl.BlockSpec((9, Cout, Cin), lambda n: (0, 0, 0)),
                pl.BlockSpec((Cout, 1), lambda n: (0, 0)),
            ],
            out_specs=pl.BlockSpec((None, Cout, Mp), lambda n: (n, 0, 0)),
        ),
        compiler_params=pltpu.CompilerParams(
            dimension_semantics=("parallel",),
            vmem_limit_bytes=_vmem_limit_bytes()),
    )(xs, wt, bb)

    # (N, Cout, Mp) -> (N, Cout, Ho, Wo): drop pad lanes + per-row garbage column.
    # This slice fuses into the next layer's space-to-depth copy.
    y = out[:, :, :Mo].reshape(N, Cout, Ho, Wo + 1)[:, :, :, :Wo]
    return y


# --------------------------------------------------------------------------
# LSDFEncoder forward (NCHW in, NCHW out) + param init
# --------------------------------------------------------------------------
def init_lsdf_encoder_params(key, enc_nf):
    params = []
    for i, out_c in enumerate(enc_nf):
        in_c = 1 if i == 0 else enc_nf[i - 1]
        key, kw, kb = jax.random.split(key, 3)
        fan_in = in_c * 9
        w = jax.random.normal(kw, (out_c, in_c, 3, 3), jnp.float32) * (1.0 / fan_in) ** 0.5
        b_ = jax.random.normal(kb, (out_c,), jnp.float32) * 0.01
        params.append((w, b_))
    return params


def lsdf_encoder_forward(params, src_nchw, *, use_bf16=True):
    """Returns [src, x1, x2, ...] exactly like the PyTorch LSDFEncoder.forward."""
    x_enc = [src_nchw]
    for (w, b) in params:
        x_enc.append(conv2d_s2_lrelu_pallas(x_enc[-1], w, b, use_bf16=use_bf16))
    return x_enc


# --------------------------------------------------------------------------
# Pure-JAX reference for the sanity check
# --------------------------------------------------------------------------
def _ref_layer(x, w, b):
    y = lax.conv_general_dilated(
        x, w, window_strides=(2, 2), padding=((1, 1), (1, 1)),
        dimension_numbers=("NCHW", "OIHW", "NCHW"))
    y = y + b.reshape(1, -1, 1, 1)
    return jnp.where(y >= 0, y, _NEG_SLOPE * y)


def _check_encoder(x_enc, params, src, atol, rtol, tag):
    ref = src
    for i, (w, b) in enumerate(params):
        ref = _ref_layer(ref, w, b)
        got = x_enc[i + 1].astype(jnp.float32)
        assert got.shape == ref.shape, (tag, i, got.shape, ref.shape)
        assert jnp.allclose(got, ref, atol=atol, rtol=rtol), (
            f"{tag}: mismatch at layer {i}, "
            f"max abs err = {float(jnp.max(jnp.abs(got - ref)))}")


if __name__ == "__main__":
    key = jax.random.PRNGKey(0)
    k_param, k_x = jax.random.split(key)

    enc_nf = [8, 16, 16]
    params = init_lsdf_encoder_params(k_param, enc_nf)

    # NCHW input, single channel (prev_nf = 1 for the first layer)
    src = jax.random.normal(k_x, (2, 1, 16, 16), jnp.float32)

    # 1) f32 path: bit-close parity with the reference.
    fwd_f32 = jax.jit(functools.partial(lsdf_encoder_forward, use_bf16=False))
    x_f32 = [jax.block_until_ready(x) for x in fwd_f32(params, src)]
    _check_encoder(x_f32, params, src, atol=1e-4, rtol=1e-4, tag="f32")

    # 2) default inference path: bf16 operands + bf16 activations, f32 accumulation.
    fwd_bf16 = jax.jit(lsdf_encoder_forward)
    x_bf16 = [jax.block_until_ready(x) for x in fwd_bf16(params, src)]
    _check_encoder(x_bf16, params, src, atol=1e-1, rtol=1e-1, tag="bf16")

    # 3) odd intermediate spatial sizes (20 -> 10 -> 5 -> 3) exercise the padding path.
    src_odd = jax.random.normal(jax.random.PRNGKey(1), (2, 1, 20, 20), jnp.float32)
    x_odd = [jax.block_until_ready(x) for x in fwd_f32(params, src_odd)]
    _check_encoder(x_odd, params, src_odd, atol=1e-4, rtol=1e-4, tag="f32-odd")

    print("KERNEL_OK")
</pallas_src>

<mosaic_0001>
module attributes {stable_mosaic.version = 11 : i64} {
  func.func @kernel(%arg0: i32, %arg1: memref<1x4x1x128xf32, #tpu.memory_space<vmem>>, %arg2: memref<9x8x1xf32, #tpu.memory_space<vmem>>, %arg3: memref<8x1xf32, #tpu.memory_space<vmem>>, %arg4: memref<1x8x128xf32, #tpu.memory_space<vmem>>) attributes {dimension_semantics = [#tpu.dimension_semantics<parallel>], iteration_bounds = array<i64: 2>, scalar_prefetch = 0 : i64, scratch_operands = 0 : i64, tpu.core_type = #tpu.core_type<tc>, window_params = [{transform_indices = @transform_0, window_bounds = array<i64: 1, 4, 1, 128>}, {pipeline_mode = #tpu.pipeline_mode<synchronous>, transform_indices = @transform_1, window_bounds = array<i64: 9, 8, 1>}, {pipeline_mode = #tpu.pipeline_mode<synchronous>, transform_indices = @transform_2, window_bounds = array<i64: 8, 1>}, {transform_indices = @transform_3, window_bounds = array<i64: 1, 8, 128>}]} {
    %cst = arith.constant 0.000000e+00 : f32
    %0 = vector.broadcast %cst : f32 to vector<8x128xf32>
    %c0 = arith.constant 0 : index
    %c0_0 = arith.constant 0 : index
    %c0_1 = arith.constant 0 : index
    %c0_2 = arith.constant 0 : index
    %1 = vector.load %arg1[%c0, %c0_0, %c0_1, %c0_2] : memref<1x4x1x128xf32, #tpu.memory_space<vmem>>, vector<1x1x1x128xf32>
    %2 = vector.shape_cast %1 : vector<1x1x1x128xf32> to vector<1x128xf32>
    %c0_3 = arith.constant 0 : index
    %c0_4 = arith.constant 0 : index
    %c0_5 = arith.constant 0 : index
    %3 = vector.load %arg2[%c0_3, %c0_4, %c0_5] : memref<9x8x1xf32, #tpu.memory_space<vmem>>, vector<1x8x1xf32>
    %4 = vector.shape_cast %3 : vector<1x8x1xf32> to vector<8x1xf32>
    %5 = vector.broadcast %4 : vector<8x1xf32> to vector<8x128xf32>
    %6 = vector.broadcast %2 : vector<1x128xf32> to vector<8x128xf32>
    %7 = arith.mulf %5, %6 : vector<8x128xf32>
    %8 = arith.addf %0, %7 : vector<8x128xf32>
    %c0_6 = arith.constant 0 : index
    %c1 = arith.constant 1 : index
    %c0_7 = arith.constant 0 : index
    %c0_8 = arith.constant 0 : index
    %9 = vector.load %arg1[%c0_6, %c1, %c0_7, %c0_8] : memref<1x4x1x128xf32, #tpu.memory_space<vmem>>, vector<1x1x1x128xf32>
    %10 = vector.shape_cast %9 : vector<1x1x1x128xf32> to vector<1x128xf32>
    %c1_9 = arith.constant 1 : index
    %c0_10 = arith.constant 0 : index
    %c0_11 = arith.constant 0 : index
    %11 = vector.load %arg2[%c1_9, %c0_10, %c0_11] : memref<9x8x1xf32, #tpu.memory_space<vmem>>, vector<1x8x1xf32>
    %12 = vector.shape_cast %11 : vector<1x8x1xf32> to vector<8x1xf32>
    %13 = vector.broadcast %12 : vector<8x1xf32> to vector<8x128xf32>
    %14 = vector.broadcast %10 : vector<1x128xf32> to vector<8x128xf32>
    %15 = arith.mulf %13, %14 : vector<8x128xf32>
    %16 = arith.addf %8, %15 : vector<8x128xf32>
    %c0_12 = arith.constant 0 : index
    %c0_13 = arith.constant 0 : index
    %c0_14 = arith.constant 0 : index
    %c0_15 = arith.constant 0 : index
    %17 = vector.load %arg1[%c0_12, %c0_13, %c0_14, %c0_15] : memref<1x4x1x128xf32, #tpu.memory_space<vmem>>, vector<1x1x1x128xf32>
    %18 = vector.shape_cast %17 : vector<1x1x1x128xf32> to vector<1x128xf32>
    %c127_i32 = arith.constant 127 : i32
    %19 = tpu.dynamic_rotate %18 by %c127_i32 dim 1 : vector<1x128xf32>, i32 -> vector<1x128xf32>
    %c2 = arith.constant 2 : index
    %c0_16 = arith.constant 0 : index
    %c0_17 = arith.constant 0 : index
    %20 = vector.load %arg2[%c2, %c0_16, %c0_17] : memref<9x8x1xf32, #tpu.memory_space<vmem>>, vector<1x8x1xf32>
    %21 = vector.shape_cast %20 : vector<1x8x1xf32> to vector<8x1xf32>
    %22 = vector.broadcast %21 : vector<8x1xf32> to vector<8x128xf32>
    %23 = vector.broadcast %19 : vector<1x128xf32> to vector<8x128xf32>
    %24 = arith.mulf %22, %23 : vector<8x128xf32>
    %25 = arith.addf %16, %24 : vector<8x128xf32>
    %c0_18 = arith.constant 0 : index
    %c2_19 = arith.constant 2 : index
    %c0_20 = arith.constant 0 : index
    %c0_21 = arith.constant 0 : index
    %26 = vector.load %arg1[%c0_18, %c2_19, %c0_20, %c0_21] : memref<1x4x1x128xf32, #tpu.memory_space<vmem>>, vector<1x1x1x128xf32>
    %27 = vector.shape_cast %26 : vector<1x1x1x128xf32> to vector<1x128xf32>
    %c3 = arith.constant 3 : index
    %c0_22 = arith.constant 0 : index
    %c0_23 = arith.constant 0 : index
    %28 = vector.load %arg2[%c3, %c0_22, %c0_23] : memref<9x8x1xf32, #tpu.memory_space<vmem>>, vector<1x8x1xf32>
    %29 = vector.shape_cast %28 : vector<1x8x1xf32> to vector<8x1xf32>
    %30 = vector.broadcast %29 : vector<8x1xf32> to vector<8x128xf32>
    %31 = vector.broadcast %27 : vector<1x128xf32> to vector<8x128xf32>
    %32 = arith.mulf %30, %31 : vector<8x128xf32>
    %33 = arith.addf %25, %32 : vector<8x128xf32>
    %c0_24 = arith.constant 0 : index
    %c3_25 = arith.constant 3 : index
    %c0_26 = arith.constant 0 : index
    %c0_27 = arith.constant 0 : index
    %34 = vector.load %arg1[%c0_24, %c3_25, %c0_26, %c0_27] : memref<1x4x1x128xf32, #tpu.memory_space<vmem>>, vector<1x1x1x128xf32>
    %35 = vector.shape_cast %34 : vector<1x1x1x128xf32> to vector<1x128xf32>
    %c4 = arith.constant 4 : index
    %c0_28 = arith.constant 0 : index
    %c0_29 = arith.constant 0 : index
    %36 = vector.load %arg2[%c4, %c0_28, %c0_29] : memref<9x8x1xf32, #tpu.memory_space<vmem>>, vector<1x8x1xf32>
    %37 = vector.shape_cast %36 : vector<1x8x1xf32> to vector<8x1xf32>
    %38 = vector.broadcast %37 : vector<8x1xf32> to vector<8x128xf32>
    %39 = vector.broadcast %35 : vector<1x128xf32> to vector<8x128xf32>
    %40 = arith.mulf %38, %39 : vector<8x128xf32>
    %41 = arith.addf %33, %40 : vector<8x128xf32>
    %c0_30 = arith.constant 0 : index
    %c2_31 = arith.constant 2 : index
    %c0_32 = arith.constant 0 : index
    %c0_33 = arith.constant 0 : index
    %42 = vector.load %arg1[%c0_30, %c2_31, %c0_32, %c0_33] : memref<1x4x1x128xf32, #tpu.memory_space<vmem>>, vector<1x1x1x128xf32>
    %43 = vector.shape_cast %42 : vector<1x1x1x128xf32> to vector<1x128xf32>
    %c127_i32_34 = arith.constant 127 : i32
    %44 = tpu.dynamic_rotate %43 by %c127_i32_34 dim 1 : vector<1x128xf32>, i32 -> vector<1x128xf32>
    %c5 = arith.constant 5 : index
    %c0_35 = arith.constant 0 : index
    %c0_36 = arith.constant 0 : index
    %45 = vector.load %arg2[%c5, %c0_35, %c0_36] : memref<9x8x1xf32, #tpu.memory_space<vmem>>, vector<1x8x1xf32>
    %46 = vector.shape_cast %45 : vector<1x8x1xf32> to vector<8x1xf32>
    %47 = vector.broadcast %46 : vector<8x1xf32> to vector<8x128xf32>
    %48 = vector.broadcast %44 : vector<1x128xf32> to vector<8x128xf32>
    %49 = arith.mulf %47, %48 : vector<8x128xf32>
    %50 = arith.addf %41, %49 : vector<8x128xf32>
    %c0_37 = arith.constant 0 : index
    %c0_38 = arith.constant 0 : index
    %c0_39 = arith.constant 0 : index
    %c0_40 = arith.constant 0 : index
    %51 = vector.load %arg1[%c0_37, %c0_38, %c0_39, %c0_40] : memref<1x4x1x128xf32, #tpu.memory_space<vmem>>, vector<1x1x1x128xf32>
    %52 = vector.shape_cast %51 : vector<1x1x1x128xf32> to vector<1x128xf32>
    %c119_i32 = arith.constant 119 : i32
    %53 = tpu.dynamic_rotate %52 by %c119_i32 dim 1 : vector<1x128xf32>, i32 -> vector<1x128xf32>
    %c6 = arith.constant 6 : index
    %c0_41 = arith.constant 0 : index
    %c0_42 = arith.constant 0 : index
    %54 = vector.load %arg2[%c6, %c0_41, %c0_42] : memref<9x8x1xf32, #tpu.memory_space<vmem>>, vector<1x8x1xf32>
    %55 = vector.shape_cast %54 : vector<1x8x1xf32> to vector<8x1xf32>
    %56 = vector.broadcast %55 : vector<8x1xf32> to vector<8x128xf32>
    %57 = vector.broadcast %53 : vector<1x128xf32> to vector<8x128xf32>
    %58 = arith.mulf %56, %57 : vector<8x128xf32>
    %59 = arith.addf %50, %58 : vector<8x128xf32>
    %c0_43 = arith.constant 0 : index
    %c1_44 = arith.constant 1 : index
    %c0_45 = arith.constant 0 : index
    %c0_46 = arith.constant 0 : index
    %60 = vector.load %arg1[%c0_43, %c1_44, %c0_45, %c0_46] : memref<1x4x1x128xf32, #tpu.memory_space<vmem>>, vector<1x1x1x128xf32>
    %61 = vector.shape_cast %60 : vector<1x1x1x128xf32> to vector<1x128xf32>
    %c119_i32_47 = arith.constant 119 : i32
    %62 = tpu.dynamic_rotate %61 by %c119_i32_47 dim 1 : vector<1x128xf32>, i32 -> vector<1x128xf32>
    %c7 = arith.constant 7 : index
    %c0_48 = arith.constant 0 : index
    %c0_49 = arith.constant 0 : index
    %63 = vector.load %arg2[%c7, %c0_48, %c0_49] : memref<9x8x1xf32, #tpu.memory_space<vmem>>, vector<1x8x1xf32>
    %64 = vector.shape_cast %63 : vector<1x8x1xf32> to vector<8x1xf32>
    %65 = vector.broadcast %64 : vector<8x1xf32> to vector<8x128xf32>
    %66 = vector.broadcast %62 : vector<1x128xf32> to vector<8x128xf32>
    %67 = arith.mulf %65, %66 : vector<8x128xf32>
    %68 = arith.addf %59, %67 : vector<8x128xf32>
    %c0_50 = arith.constant 0 : index
    %c0_51 = arith.constant 0 : index
    %c0_52 = arith.constant 0 : index
    %c0_53 = arith.constant 0 : index
    %69 = vector.load %arg1[%c0_50, %c0_51, %c0_52, %c0_53] : memref<1x4x1x128xf32, #tpu.memory_space<vmem>>, vector<1x1x1x128xf32>
    %70 = vector.shape_cast %69 : vector<1x1x1x128xf32> to vector<1x128xf32>
    %c118_i32 = arith.constant 118 : i32
    %71 = tpu.dynamic_rotate %70 by %c118_i32 dim 1 : vector<1x128xf32>, i32 -> vector<1x128xf32>
    %c8 = arith.constant 8 : index
    %c0_54 = arith.constant 0 : index
    %c0_55 = arith.constant 0 : index
    %72 = vector.load %arg2[%c8, %c0_54, %c0_55] : memref<9x8x1xf32, #tpu.memory_space<vmem>>, vector<1x8x1xf32>
    %73 = vector.shape_cast %72 : vector<1x8x1xf32> to vector<8x1xf32>
    %74 = vector.broadcast %73 : vector<8x1xf32> to vector<8x128xf32>
    %75 = vector.broadcast %71 : vector<1x128xf32> to vector<8x128xf32>
    %76 = arith.mulf %74, %75 : vector<8x128xf32>
    %77 = arith.addf %68, %76 : vector<8x128xf32>
    %c0_56 = arith.constant 0 : index
    %c0_57 = arith.constant 0 : index
    %78 = vector.load %arg3[%c0_56, %c0_57] : memref<8x1xf32, #tpu.memory_space<vmem>>, vector<8x1xf32>
    %79 = vector.broadcast %78 : vector<8x1xf32> to vector<8x128xf32>
    %80 = arith.addf %77, %79 : vector<8x128xf32>
    %cst_58 = arith.constant 0.000000e+00 : f32
    %81 = vector.broadcast %cst_58 : f32 to vector<8x128xf32>
    %82 = arith.cmpf oge, %80, %81 : vector<8x128xf32>
    %cst_59 = arith.constant 2.000000e-01 : f32
    %83 = vector.broadcast %cst_59 : f32 to vector<8x128xf32>
    %84 = arith.mulf %83, %80 : vector<8x128xf32>
    %85 = arith.select %82, %80, %84 : vector<8x128xi1>, vector<8x128xf32>
    %c0_60 = arith.constant 0 : index
    %c0_61 = arith.constant 0 : index
    %c0_62 = arith.constant 0 : index
    %86 = vector.load %arg4[%c0_60, %c0_61, %c0_62] : memref<1x8x128xf32, #tpu.memory_space<vmem>>, vector<1x8x128xf32>
    %87 = vector.shape_cast %86 : vector<1x8x128xf32> to vector<8x128xf32>
    %88 = vector.shape_cast %85 : vector<8x128xf32> to vector<1x8x128xf32>
    tpu.vector_store %arg4[%c0_60, %c0_61, %c0_62], %88 {strides = array<i32>} : memref<1x8x128xf32, #tpu.memory_space<vmem>>, vector<1x8x128xf32>,
    return
  }
  func.func @transform_0(%arg0: i32) -> (i32, i32, i32, i32) {
    %c0_i32 = arith.constant 0 : i32
    %c0_i32_0 = arith.constant 0 : i32
    %c0_i32_1 = arith.constant 0 : i32
    %c0_i32_2 = arith.constant 0 : i32
    return %arg0, %c0_i32, %c0_i32_0, %c0_i32_1 : i32, i32, i32, i32
  }
  func.func @transform_1(%arg0: i32) -> (i32, i32, i32) {
    %c0_i32 = arith.constant 0 : i32
    %c0_i32_0 = arith.constant 0 : i32
    %c0_i32_1 = arith.constant 0 : i32
    %c0_i32_2 = arith.constant 0 : i32
    return %c0_i32, %c0_i32_0, %c0_i32_1 : i32, i32, i32
  }
  func.func @transform_2(%arg0: i32) -> (i32, i32) {
    %c0_i32 = arith.constant 0 : i32
    %c0_i32_0 = arith.constant 0 : i32
    %c0_i32_1 = arith.constant 0 : i32
    return %c0_i32, %c0_i32_0 : i32, i32
  }
  func.func @transform_3(%arg0: i32) -> (i32, i32, i32) {
    %c0_i32 = arith.constant 0 : i32
    %c0_i32_0 = arith.constant 0 : i32
    %c0_i32_1 = arith.constant 0 : i32
    return %arg0, %c0_i32, %c0_i32_0 : i32, i32, i32
  }
}

module attributes {stable_mosaic.version = 11 : i64} {
  func.func @kernel(%arg0: i32, %arg1: memref<1x4x8x128xf32, #tpu.memory_space<vmem>>, %arg2: memref<9x16x8xf32, #tpu.memory_space<vmem>>, %arg3: memref<16x1xf32, #tpu.memory_space<vmem>>, %arg4: memref<1x16x128xf32, #tpu.memory_space<vmem>>) attributes {dimension_semantics = [#tpu.dimension_semantics<parallel>], iteration_bounds = array<i64: 2>, scalar_prefetch = 0 : i64, scratch_operands = 0 : i64, tpu.core_type = #tpu.core_type<tc>, window_params = [{transform_indices = @transform_0, window_bounds = array<i64: 1, 4, 8, 128>}, {pipeline_mode = #tpu.pipeline_mode<synchronous>, transform_indices = @transform_1, window_bounds = array<i64: 9, 16, 8>}, {pipeline_mode = #tpu.pipeline_mode<synchronous>, transform_indices = @transform_2, window_bounds = array<i64: 16, 1>}, {transform_indices = @transform_3, window_bounds = array<i64: 1, 16, 128>}]} {
    %cst = arith.constant 0.000000e+00 : f32
    %0 = vector.broadcast %cst : f32 to vector<16x128xf32>
    %c0 = arith.constant 0 : index
    %c0_0 = arith.constant 0 : index
    %c0_1 = arith.constant 0 : index
    %c0_2 = arith.constant 0 : index
    %1 = vector.load %arg1[%c0, %c0_0, %c0_1, %c0_2] : memref<1x4x8x128xf32, #tpu.memory_space<vmem>>, vector<1x1x8x128xf32>
    %2 = vector.shape_cast %1 : vector<1x1x8x128xf32> to vector<8x128xf32>
    %c0_3 = arith.constant 0 : index
    %c0_4 = arith.constant 0 : index
    %c0_5 = arith.constant 0 : index
    %3 = vector.load %arg2[%c0_3, %c0_4, %c0_5] : memref<9x16x8xf32, #tpu.memory_space<vmem>>, vector<1x16x8xf32>
    %4 = vector.shape_cast %3 : vector<1x16x8xf32> to vector<16x8xf32>
    %cst_6 = arith.constant dense<0.000000e+00> : vector<16x128xf32>
    %5 = tpu.matmul %4, %2, %cst_6 {dimension_numbers = #tpu.dot_dimension_numbers<[1], [0], [0], [1], [0, 0, 1, 1], [], []>} : vector<16x8xf32>, vector<8x128xf32>, vector<16x128xf32> -> vector<16x128xf32>
    %6 = arith.addf %0, %5 : vector<16x128xf32>
    %c0_7 = arith.constant 0 : index
    %c1 = arith.constant 1 : index
    %c0_8 = arith.constant 0 : index
    %c0_9 = arith.constant 0 : index
    %7 = vector.load %arg1[%c0_7, %c1, %c0_8, %c0_9] : memref<1x4x8x128xf32, #tpu.memory_space<vmem>>, vector<1x1x8x128xf32>
    %8 = vector.shape_cast %7 : vector<1x1x8x128xf32> to vector<8x128xf32>
    %c1_10 = arith.constant 1 : index
    %c0_11 = arith.constant 0 : index
    %c0_12 = arith.constant 0 : index
    %9 = vector.load %arg2[%c1_10, %c0_11, %c0_12] : memref<9x16x8xf32, #tpu.memory_space<vmem>>, vector<1x16x8xf32>
    %10 = vector.shape_cast %9 : vector<1x16x8xf32> to vector<16x8xf32>
    %cst_13 = arith.constant dense<0.000000e+00> : vector<16x128xf32>
    %11 = tpu.matmul %10, %8, %cst_13 {dimension_numbers = #tpu.dot_dimension_numbers<[1], [0], [0], [1], [0, 0, 1, 1], [], []>} : vector<16x8xf32>, vector<8x128xf32>, vector<16x128xf32> -> vector<16x128xf32>
    %12 = arith.addf %6, %11 : vector<16x128xf32>
    %c0_14 = arith.constant 0 : index
    %c0_15 = arith.constant 0 : index
    %c0_16 = arith.constant 0 : index
    %c0_17 = arith.constant 0 : index
    %13 = vector.load %arg1[%c0_14, %c0_15, %c0_16, %c0_17] : memref<1x4x8x128xf32, #tpu.memory_space<vmem>>, vector<1x1x8x128xf32>
    %14 = vector.shape_cast %13 : vector<1x1x8x128xf32> to vector<8x128xf32>
    %c127_i32 = arith.constant 127 : i32
    %15 = tpu.dynamic_rotate %14 by %c127_i32 dim 1 : vector<8x128xf32>, i32 -> vector<8x128xf32>
    %c2 = arith.constant 2 : index
    %c0_18 = arith.constant 0 : index
    %c0_19 = arith.constant 0 : index
    %16 = vector.load %arg2[%c2, %c0_18, %c0_19] : memref<9x16x8xf32, #tpu.memory_space<vmem>>, vector<1x16x8xf32>
    %17 = vector.shape_cast %16 : vector<1x16x8xf32> to vector<16x8xf32>
    %cst_20 = arith.constant dense<0.000000e+00> : vector<16x128xf32>
    %18 = tpu.matmul %17, %15, %cst_20 {dimension_numbers = #tpu.dot_dimension_numbers<[1], [0], [0], [1], [0, 0, 1, 1], [], []>} : vector<16x8xf32>, vector<8x128xf32>, vector<16x128xf32> -> vector<16x128xf32>
    %19 = arith.addf %12, %18 : vector<16x128xf32>
    %c0_21 = arith.constant 0 : index
    %c2_22 = arith.constant 2 : index
    %c0_23 = arith.constant 0 : index
    %c0_24 = arith.constant 0 : index
    %20 = vector.load %arg1[%c0_21, %c2_22, %c0_23, %c0_24] : memref<1x4x8x128xf32, #tpu.memory_space<vmem>>, vector<1x1x8x128xf32>
    %21 = vector.shape_cast %20 : vector<1x1x8x128xf32> to vector<8x128xf32>
    %c3 = arith.constant 3 : index
    %c0_25 = arith.constant 0 : index
    %c0_26 = arith.constant 0 : index
    %22 = vector.load %arg2[%c3, %c0_25, %c0_26] : memref<9x16x8xf32, #tpu.memory_space<vmem>>, vector<1x16x8xf32>
    %23 = vector.shape_cast %22 : vector<1x16x8xf32> to vector<16x8xf32>
    %cst_27 = arith.constant dense<0.000000e+00> : vector<16x128xf32>
    %24 = tpu.matmul %23, %21, %cst_27 {dimension_numbers = #tpu.dot_dimension_numbers<[1], [0], [0], [1], [0, 0, 1, 1], [], []>} : vector<16x8xf32>, vector<8x128xf32>, vector<16x128xf32> -> vector<16x128xf32>
    %25 = arith.addf %19, %24 : vector<16x128xf32>
    %c0_28 = arith.constant 0 : index
    %c3_29 = arith.constant 3 : index
    %c0_30 = arith.constant 0 : index
    %c0_31 = arith.constant 0 : index
    %26 = vector.load %arg1[%c0_28, %c3_29, %c0_30, %c0_31] : memref<1x4x8x128xf32, #tpu.memory_space<vmem>>, vector<1x1x8x128xf32>
    %27 = vector.shape_cast %26 : vector<1x1x8x128xf32> to vector<8x128xf32>
    %c4 = arith.constant 4 : index
    %c0_32 = arith.constant 0 : index
    %c0_33 = arith.constant 0 : index
    %28 = vector.load %arg2[%c4, %c0_32, %c0_33] : memref<9x16x8xf32, #tpu.memory_space<vmem>>, vector<1x16x8xf32>
    %29 = vector.shape_cast %28 : vector<1x16x8xf32> to vector<16x8xf32>
    %cst_34 = arith.constant dense<0.000000e+00> : vector<16x128xf32>
    %30 = tpu.matmul %29, %27, %cst_34 {dimension_numbers = #tpu.dot_dimension_numbers<[1], [0], [0], [1], [0, 0, 1, 1], [], []>} : vector<16x8xf32>, vector<8x128xf32>, vector<16x128xf32> -> vector<16x128xf32>
    %31 = arith.addf %25, %30 : vector<16x128xf32>
    %c0_35 = arith.constant 0 : index
    %c2_36 = arith.constant 2 : index
    %c0_37 = arith.constant 0 : index
    %c0_38 = arith.constant 0 : index
    %32 = vector.load %arg1[%c0_35, %c2_36, %c0_37, %c0_38] : memref<1x4x8x128xf32, #tpu.memory_space<vmem>>, vector<1x1x8x128xf32>
    %33 = vector.shape_cast %32 : vector<1x1x8x128xf32> to vector<8x128xf32>
    %c127_i32_39 = arith.constant 127 : i32
    %34 = tpu.dynamic_rotate %33 by %c127_i32_39 dim 1 : vector<8x128xf32>, i32 -> vector<8x128xf32>
    %c5 = arith.constant 5 : index
    %c0_40 = arith.constant 0 : index
    %c0_41 = arith.constant 0 : index
    %35 = vector.load %arg2[%c5, %c0_40, %c0_41] : memref<9x16x8xf32, #tpu.memory_space<vmem>>, vector<1x16x8xf32>
    %36 = vector.shape_cast %35 : vector<1x16x8xf32> to vector<16x8xf32>
    %cst_42 = arith.constant dense<0.000000e+00> : vector<16x128xf32>
    %37 = tpu.matmul %36, %34, %cst_42 {dimension_numbers = #tpu.dot_dimension_numbers<[1], [0], [0], [1], [0, 0, 1, 1], [], []>} : vector<16x8xf32>, vector<8x128xf32>, vector<16x128xf32> -> vector<16x128xf32>
    %38 = arith.addf %31, %37 : vector<16x128xf32>
    %c0_43 = arith.constant 0 : index
    %c0_44 = arith.constant 0 : index
    %c0_45 = arith.constant 0 : index
    %c0_46 = arith.constant 0 : index
    %39 = vector.load %arg1[%c0_43, %c0_44, %c0_45, %c0_46] : memref<1x4x8x128xf32, #tpu.memory_space<vmem>>, vector<1x1x8x128xf32>
    %40 = vector.shape_cast %39 : vector<1x1x8x128xf32> to vector<8x128xf32>
    %c123_i32 = arith.constant 123 : i32
    %41 = tpu.dynamic_rotate %40 by %c123_i32 dim 1 : vector<8x128xf32>, i32 -> vector<8x128xf32>
    %c6 = arith.constant 6 : index
    %c0_47 = arith.constant 0 : index
    %c0_48 = arith.constant 0 : index
    %42 = vector.load %arg2[%c6, %c0_47, %c0_48] : memref<9x16x8xf32, #tpu.memory_space<vmem>>, vector<1x16x8xf32>
    %43 = vector.shape_cast %42 : vector<1x16x8xf32> to vector<16x8xf32>
    %cst_49 = arith.constant dense<0.000000e+00> : vector<16x128xf32>
    %44 = tpu.matmul %43, %41, %cst_49 {dimension_numbers = #tpu.dot_dimension_numbers<[1], [0], [0], [1], [0, 0, 1, 1], [], []>} : vector<16x8xf32>, vector<8x128xf32>, vector<16x128xf32> -> vector<16x128xf32>
    %45 = arith.addf %38, %44 : vector<16x128xf32>
    %c0_50 = arith.constant 0 : index
    %c1_51 = arith.constant 1 : index
    %c0_52 = arith.constant 0 : index
    %c0_53 = arith.constant 0 : index
    %46 = vector.load %arg1[%c0_50, %c1_51, %c0_52, %c0_53] : memref<1x4x8x128xf32, #tpu.memory_space<vmem>>, vector<1x1x8x128xf32>
    %47 = vector.shape_cast %46 : vector<1x1x8x128xf32> to vector<8x128xf32>
    %c123_i32_54 = arith.constant 123 : i32
    %48 = tpu.dynamic_rotate %47 by %c123_i32_54 dim 1 : vector<8x128xf32>, i32 -> vector<8x128xf32>
    %c7 = arith.constant 7 : index
    %c0_55 = arith.constant 0 : index
    %c0_56 = arith.constant 0 : index
    %49 = vector.load %arg2[%c7, %c0_55, %c0_56] : memref<9x16x8xf32, #tpu.memory_space<vmem>>, vector<1x16x8xf32>
    %50 = vector.shape_cast %49 : vector<1x16x8xf32> to vector<16x8xf32>
    %cst_57 = arith.constant dense<0.000000e+00> : vector<16x128xf32>
    %51 = tpu.matmul %50, %48, %cst_57 {dimension_numbers = #tpu.dot_dimension_numbers<[1], [0], [0], [1], [0, 0, 1, 1], [], []>} : vector<16x8xf32>, vector<8x128xf32>, vector<16x128xf32> -> vector<16x128xf32>
    %52 = arith.addf %45, %51 : vector<16x128xf32>
    %c0_58 = arith.constant 0 : index
    %c0_59 = arith.constant 0 : index
    %c0_60 = arith.constant 0 : index
    %c0_61 = arith.constant 0 : index
    %53 = vector.load %arg1[%c0_58, %c0_59, %c0_60, %c0_61] : memref<1x4x8x128xf32, #tpu.memory_space<vmem>>, vector<1x1x8x128xf32>
    %54 = vector.shape_cast %53 : vector<1x1x8x128xf32> to vector<8x128xf32>
    %c122_i32 = arith.constant 122 : i32
    %55 = tpu.dynamic_rotate %54 by %c122_i32 dim 1 : vector<8x128xf32>, i32 -> vector<8x128xf32>
    %c8 = arith.constant 8 : index
    %c0_62 = arith.constant 0 : index
    %c0_63 = arith.constant 0 : index
    %56 = vector.load %arg2[%c8, %c0_62, %c0_63] : memref<9x16x8xf32, #tpu.memory_space<vmem>>, vector<1x16x8xf32>
    %57 = vector.shape_cast %56 : vector<1x16x8xf32> to vector<16x8xf32>
    %cst_64 = arith.constant dense<0.000000e+00> : vector<16x128xf32>
    %58 = tpu.matmul %57, %55, %cst_64 {dimension_numbers = #tpu.dot_dimension_numbers<[1], [0], [0], [1], [0, 0, 1, 1], [], []>} : vector<16x8xf32>, vector<8x128xf32>, vector<16x128xf32> -> vector<16x128xf32>
    %59 = arith.addf %52, %58 : vector<16x128xf32>
    %c0_65 = arith.constant 0 : index
    %c0_66 = arith.constant 0 : index
    %60 = vector.load %arg3[%c0_65, %c0_66] : memref<16x1xf32, #tpu.memory_space<vmem>>, vector<16x1xf32>
    %61 = vector.broadcast %60 : vector<16x1xf32> to vector<16x128xf32>
    %62 = arith.addf %59, %61 : vector<16x128xf32>
    %cst_67 = arith.constant 0.000000e+00 : f32
    %63 = vector.broadcast %cst_67 : f32 to vector<16x128xf32>
    %64 = arith.cmpf oge, %62, %63 : vector<16x128xf32>
    %cst_68 = arith.constant 2.000000e-01 : f32
    %65 = vector.broadcast %cst_68 : f32 to vector<16x128xf32>
    %66 = arith.mulf %65, %62 : vector<16x128xf32>
    %67 = arith.select %64, %62, %66 : vector<16x128xi1>, vector<16x128xf32>
    %c0_69 = arith.constant 0 : index
    %c0_70 = arith.constant 0 : index
    %c0_71 = arith.constant 0 : index
    %68 = vector.load %arg4[%c0_69, %c0_70, %c0_71] : memref<1x16x128xf32, #tpu.memory_space<vmem>>, vector<1x16x128xf32>
    %69 = vector.shape_cast %68 : vector<1x16x128xf32> to vector<16x128xf32>
    %70 = vector.shape_cast %67 : vector<16x128xf32> to vector<1x16x128xf32>
    tpu.vector_store %arg4[%c0_69, %c0_70, %c0_71], %70 {strides = array<i32>} : memref<1x16x128xf32, #tpu.memory_space<vmem>>, vector<1x16x128xf32>,
    return
  }
  func.func @transform_0(%arg0: i32) -> (i32, i32, i32, i32) {
    %c0_i32 = arith.constant 0 : i32
    %c0_i32_0 = arith.constant 0 : i32
    %c0_i32_1 = arith.constant 0 : i32
    %c0_i32_2 = arith.constant 0 : i32
    return %arg0, %c0_i32, %c0_i32_0, %c0_i32_1 : i32, i32, i32, i32
  }
  func.func @transform_1(%arg0: i32) -> (i32, i32, i32) {
    %c0_i32 = arith.constant 0 : i32
    %c0_i32_0 = arith.constant 0 : i32
    %c0_i32_1 = arith.constant 0 : i32
    %c0_i32_2 = arith.constant 0 : i32
    return %c0_i32, %c0_i32_0, %c0_i32_1 : i32, i32, i32
  }
  func.func @transform_2(%arg0: i32) -> (i32, i32) {
    %c0_i32 = arith.constant 0 : i32
    %c0_i32_0 = arith.constant 0 : i32
    %c0_i32_1 = arith.constant 0 : i32
    return %c0_i32, %c0_i32_0 : i32, i32
  }
  func.func @transform_3(%arg0: i32) -> (i32, i32, i32) {
    %c0_i32 = arith.constant 0 : i32
    %c0_i32_0 = arith.constant 0 : i32
    %c0_i32_1 = arith.constant 0 : i32
    return %arg0, %c0_i32, %c0_i32_0 : i32, i32, i32
  }
}

module attributes {stable_mosaic.version = 11 : i64} {
  func.func @kernel(%arg0: i32, %arg1: memref<1x4x16x128xf32, #tpu.memory_space<vmem>>, %arg2: memref<9x16x16xf32, #tpu.memory_space<vmem>>, %arg3: memref<16x1xf32, #tpu.memory_space<vmem>>, %arg4: memref<1x16x128xf32, #tpu.memory_space<vmem>>) attributes {dimension_semantics = [#tpu.dimension_semantics<parallel>], iteration_bounds = array<i64: 2>, scalar_prefetch = 0 : i64, scratch_operands = 0 : i64, tpu.core_type = #tpu.core_type<tc>, window_params = [{transform_indices = @transform_0, window_bounds = array<i64: 1, 4, 16, 128>}, {pipeline_mode = #tpu.pipeline_mode<synchronous>, transform_indices = @transform_1, window_bounds = array<i64: 9, 16, 16>}, {pipeline_mode = #tpu.pipeline_mode<synchronous>, transform_indices = @transform_2, window_bounds = array<i64: 16, 1>}, {transform_indices = @transform_3, window_bounds = array<i64: 1, 16, 128>}]} {
    %cst = arith.constant 0.000000e+00 : f32
    %0 = vector.broadcast %cst : f32 to vector<16x128xf32>
    %c0 = arith.constant 0 : index
    %c0_0 = arith.constant 0 : index
    %c0_1 = arith.constant 0 : index
    %c0_2 = arith.constant 0 : index
    %1 = vector.load %arg1[%c0, %c0_0, %c0_1, %c0_2] : memref<1x4x16x128xf32, #tpu.memory_space<vmem>>, vector<1x1x16x128xf32>
    %2 = vector.shape_cast %1 : vector<1x1x16x128xf32> to vector<16x128xf32>
    %c0_3 = arith.constant 0 : index
    %c0_4 = arith.constant 0 : index
    %c0_5 = arith.constant 0 : index
    %3 = vector.load %arg2[%c0_3, %c0_4, %c0_5] : memref<9x16x16xf32, #tpu.memory_space<vmem>>, vector<1x16x16xf32>
    %4 = vector.shape_cast %3 : vector<1x16x16xf32> to vector<16x16xf32>
    %cst_6 = arith.constant dense<0.000000e+00> : vector<16x128xf32>
    %5 = tpu.matmul %4, %2, %cst_6 {dimension_numbers = #tpu.dot_dimension_numbers<[1], [0], [0], [1], [0, 0, 1, 1], [], []>} : vector<16x16xf32>, vector<16x128xf32>, vector<16x128xf32> -> vector<16x128xf32>
    %6 = arith.addf %0, %5 : vector<16x128xf32>
    %c0_7 = arith.constant 0 : index
    %c1 = arith.constant 1 : index
    %c0_8 = arith.constant 0 : index
    %c0_9 = arith.constant 0 : index
    %7 = vector.load %arg1[%c0_7, %c1, %c0_8, %c0_9] : memref<1x4x16x128xf32, #tpu.memory_space<vmem>>, vector<1x1x16x128xf32>
    %8 = vector.shape_cast %7 : vector<1x1x16x128xf32> to vector<16x128xf32>
    %c1_10 = arith.constant 1 : index
    %c0_11 = arith.constant 0 : index
    %c0_12 = arith.constant 0 : index
    %9 = vector.load %arg2[%c1_10, %c0_11, %c0_12] : memref<9x16x16xf32, #tpu.memory_space<vmem>>, vector<1x16x16xf32>
    %10 = vector.shape_cast %9 : vector<1x16x16xf32> to vector<16x16xf32>
    %cst_13 = arith.constant dense<0.000000e+00> : vector<16x128xf32>
    %11 = tpu.matmul %10, %8, %cst_13 {dimension_numbers = #tpu.dot_dimension_numbers<[1], [0], [0], [1], [0, 0, 1, 1], [], []>} : vector<16x16xf32>, vector<16x128xf32>, vector<16x128xf32> -> vector<16x128xf32>
    %12 = arith.addf %6, %11 : vector<16x128xf32>
    %c0_14 = arith.constant 0 : index
    %c0_15 = arith.constant 0 : index
    %c0_16 = arith.constant 0 : index
    %c0_17 = arith.constant 0 : index
    %13 = vector.load %arg1[%c0_14, %c0_15, %c0_16, %c0_17] : memref<1x4x16x128xf32, #tpu.memory_space<vmem>>, vector<1x1x16x128xf32>
    %14 = vector.shape_cast %13 : vector<1x1x16x128xf32> to vector<16x128xf32>
    %c127_i32 = arith.constant 127 : i32
    %15 = tpu.dynamic_rotate %14 by %c127_i32 dim 1 : vector<16x128xf32>, i32 -> vector<16x128xf32>
    %c2 = arith.constant 2 : index
    %c0_18 = arith.constant 0 : index
    %c0_19 = arith.constant 0 : index
    %16 = vector.load %arg2[%c2, %c0_18, %c0_19] : memref<9x16x16xf32, #tpu.memory_space<vmem>>, vector<1x16x16xf32>
    %17 = vector.shape_cast %16 : vector<1x16x16xf32> to vector<16x16xf32>
    %cst_20 = arith.constant dense<0.000000e+00> : vector<16x128xf32>
    %18 = tpu.matmul %17, %15, %cst_20 {dimension_numbers = #tpu.dot_dimension_numbers<[1], [0], [0], [1], [0, 0, 1, 1], [], []>} : vector<16x16xf32>, vector<16x128xf32>, vector<16x128xf32> -> vector<16x128xf32>
    %19 = arith.addf %12, %18 : vector<16x128xf32>
    %c0_21 = arith.constant 0 : index
    %c2_22 = arith.constant 2 : index
    %c0_23 = arith.constant 0 : index
    %c0_24 = arith.constant 0 : index
    %20 = vector.load %arg1[%c0_21, %c2_22, %c0_23, %c0_24] : memref<1x4x16x128xf32, #tpu.memory_space<vmem>>, vector<1x1x16x128xf32>
    %21 = vector.shape_cast %20 : vector<1x1x16x128xf32> to vector<16x128xf32>
    %c3 = arith.constant 3 : index
    %c0_25 = arith.constant 0 : index
    %c0_26 = arith.constant 0 : index
    %22 = vector.load %arg2[%c3, %c0_25, %c0_26] : memref<9x16x16xf32, #tpu.memory_space<vmem>>, vector<1x16x16xf32>
    %23 = vector.shape_cast %22 : vector<1x16x16xf32> to vector<16x16xf32>
    %cst_27 = arith.constant dense<0.000000e+00> : vector<16x128xf32>
    %24 = tpu.matmul %23, %21, %cst_27 {dimension_numbers = #tpu.dot_dimension_numbers<[1], [0], [0], [1], [0, 0, 1, 1], [], []>} : vector<16x16xf32>, vector<16x128xf32>, vector<16x128xf32> -> vector<16x128xf32>
    %25 = arith.addf %19, %24 : vector<16x128xf32>
    %c0_28 = arith.constant 0 : index
    %c3_29 = arith.constant 3 : index
    %c0_30 = arith.constant 0 : index
    %c0_31 = arith.constant 0 : index
    %26 = vector.load %arg1[%c0_28, %c3_29, %c0_30, %c0_31] : memref<1x4x16x128xf32, #tpu.memory_space<vmem>>, vector<1x1x16x128xf32>
    %27 = vector.shape_cast %26 : vector<1x1x16x128xf32> to vector<16x128xf32>
    %c4 = arith.constant 4 : index
    %c0_32 = arith.constant 0 : index
    %c0_33 = arith.constant 0 : index
    %28 = vector.load %arg2[%c4, %c0_32, %c0_33] : memref<9x16x16xf32, #tpu.memory_space<vmem>>, vector<1x16x16xf32>
    %29 = vector.shape_cast %28 : vector<1x16x16xf32> to vector<16x16xf32>
    %cst_34 = arith.constant dense<0.000000e+00> : vector<16x128xf32>
    %30 = tpu.matmul %29, %27, %cst_34 {dimension_numbers = #tpu.dot_dimension_numbers<[1], [0], [0], [1], [0, 0, 1, 1], [], []>} : vector<16x16xf32>, vector<16x128xf32>, vector<16x128xf32> -> vector<16x128xf32>
    %31 = arith.addf %25, %30 : vector<16x128xf32>
    %c0_35 = arith.constant 0 : index
    %c2_36 = arith.constant 2 : index
    %c0_37 = arith.constant 0 : index
    %c0_38 = arith.constant 0 : index
    %32 = vector.load %arg1[%c0_35, %c2_36, %c0_37, %c0_38] : memref<1x4x16x128xf32, #tpu.memory_space<vmem>>, vector<1x1x16x128xf32>
    %33 = vector.shape_cast %32 : vector<1x1x16x128xf32> to vector<16x128xf32>
    %c127_i32_39 = arith.constant 127 : i32
    %34 = tpu.dynamic_rotate %33 by %c127_i32_39 dim 1 : vector<16x128xf32>, i32 -> vector<16x128xf32>
    %c5 = arith.constant 5 : index
    %c0_40 = arith.constant 0 : index
    %c0_41 = arith.constant 0 : index
    %35 = vector.load %arg2[%c5, %c0_40, %c0_41] : memref<9x16x16xf32, #tpu.memory_space<vmem>>, vector<1x16x16xf32>
    %36 = vector.shape_cast %35 : vector<1x16x16xf32> to vector<16x16xf32>
    %cst_42 = arith.constant dense<0.000000e+00> : vector<16x128xf32>
    %37 = tpu.matmul %36, %34, %cst_42 {dimension_numbers = #tpu.dot_dimension_numbers<[1], [0], [0], [1], [0, 0, 1, 1], [], []>} : vector<16x16xf32>, vector<16x128xf32>, vector<16x128xf32> -> vector<16x128xf32>
    %38 = arith.addf %31, %37 : vector<16x128xf32>
    %c0_43 = arith.constant 0 : index
    %c0_44 = arith.constant 0 : index
    %c0_45 = arith.constant 0 : index
    %c0_46 = arith.constant 0 : index
    %39 = vector.load %arg1[%c0_43, %c0_44, %c0_45, %c0_46] : memref<1x4x16x128xf32, #tpu.memory_space<vmem>>, vector<1x1x16x128xf32>
    %40 = vector.shape_cast %39 : vector<1x1x16x128xf32> to vector<16x128xf32>
    %c125_i32 = arith.constant 125 : i32
    %41 = tpu.dynamic_rotate %40 by %c125_i32 dim 1 : vector<16x128xf32>, i32 -> vector<16x128xf32>
    %c6 = arith.constant 6 : index
    %c0_47 = arith.constant 0 : index
    %c0_48 = arith.constant 0 : index
    %42 = vector.load %arg2[%c6, %c0_47, %c0_48] : memref<9x16x16xf32, #tpu.memory_space<vmem>>, vector<1x16x16xf32>
    %43 = vector.shape_cast %42 : vector<1x16x16xf32> to vector<16x16xf32>
    %cst_49 = arith.constant dense<0.000000e+00> : vector<16x128xf32>
    %44 = tpu.matmul %43, %41, %cst_49 {dimension_numbers = #tpu.dot_dimension_numbers<[1], [0], [0], [1], [0, 0, 1, 1], [], []>} : vector<16x16xf32>, vector<16x128xf32>, vector<16x128xf32> -> vector<16x128xf32>
    %45 = arith.addf %38, %44 : vector<16x128xf32>
    %c0_50 = arith.constant 0 : index
    %c1_51 = arith.constant 1 : index
    %c0_52 = arith.constant 0 : index
    %c0_53 = arith.constant 0 : index
    %46 = vector.load %arg1[%c0_50, %c1_51, %c0_52, %c0_53] : memref<1x4x16x128xf32, #tpu.memory_space<vmem>>, vector<1x1x16x128xf32>
    %47 = vector.shape_cast %46 : vector<1x1x16x128xf32> to vector<16x128xf32>
    %c125_i32_54 = arith.constant 125 : i32
    %48 = tpu.dynamic_rotate %47 by %c125_i32_54 dim 1 : vector<16x128xf32>, i32 -> vector<16x128xf32>
    %c7 = arith.constant 7 : index
    %c0_55 = arith.constant 0 : index
    %c0_56 = arith.constant 0 : index
    %49 = vector.load %arg2[%c7, %c0_55, %c0_56] : memref<9x16x16xf32, #tpu.memory_space<vmem>>, vector<1x16x16xf32>
    %50 = vector.shape_cast %49 : vector<1x16x16xf32> to vector<16x16xf32>
    %cst_57 = arith.constant dense<0.000000e+00> : vector<16x128xf32>
    %51 = tpu.matmul %50, %48, %cst_57 {dimension_numbers = #tpu.dot_dimension_numbers<[1], [0], [0], [1], [0, 0, 1, 1], [], []>} : vector<16x16xf32>, vector<16x128xf32>, vector<16x128xf32> -> vector<16x128xf32>
    %52 = arith.addf %45, %51 : vector<16x128xf32>
    %c0_58 = arith.constant 0 : index
    %c0_59 = arith.constant 0 : index
    %c0_60 = arith.constant 0 : index
    %c0_61 = arith.constant 0 : index
    %53 = vector.load %arg1[%c0_58, %c0_59, %c0_60, %c0_61] : memref<1x4x16x128xf32, #tpu.memory_space<vmem>>, vector<1x1x16x128xf32>
    %54 = vector.shape_cast %53 : vector<1x1x16x128xf32> to vector<16x128xf32>
    %c124_i32 = arith.constant 124 : i32
    %55 = tpu.dynamic_rotate %54 by %c124_i32 dim 1 : vector<16x128xf32>, i32 -> vector<16x128xf32>
    %c8 = arith.constant 8 : index
    %c0_62 = arith.constant 0 : index
    %c0_63 = arith.constant 0 : index
    %56 = vector.load %arg2[%c8, %c0_62, %c0_63] : memref<9x16x16xf32, #tpu.memory_space<vmem>>, vector<1x16x16xf32>
    %57 = vector.shape_cast %56 : vector<1x16x16xf32> to vector<16x16xf32>
    %cst_64 = arith.constant dense<0.000000e+00> : vector<16x128xf32>
    %58 = tpu.matmul %57, %55, %cst_64 {dimension_numbers = #tpu.dot_dimension_numbers<[1], [0], [0], [1], [0, 0, 1, 1], [], []>} : vector<16x16xf32>, vector<16x128xf32>, vector<16x128xf32> -> vector<16x128xf32>
    %59 = arith.addf %52, %58 : vector<16x128xf32>
    %c0_65 = arith.constant 0 : index
    %c0_66 = arith.constant 0 : index
    %60 = vector.load %arg3[%c0_65, %c0_66] : memref<16x1xf32, #tpu.memory_space<vmem>>, vector<16x1xf32>
    %61 = vector.broadcast %60 : vector<16x1xf32> to vector<16x128xf32>
    %62 = arith.addf %59, %61 : vector<16x128xf32>
    %cst_67 = arith.constant 0.000000e+00 : f32
    %63 = vector.broadcast %cst_67 : f32 to vector<16x128xf32>
    %64 = arith.cmpf oge, %62, %63 : vector<16x128xf32>
    %cst_68 = arith.constant 2.000000e-01 : f32
    %65 = vector.broadcast %cst_68 : f32 to vector<16x128xf32>
    %66 = arith.mulf %65, %62 : vector<16x128xf32>
    %67 = arith.select %64, %62, %66 : vector<16x128xi1>, vector<16x128xf32>
    %c0_69 = arith.constant 0 : index
    %c0_70 = arith.constant 0 : index
    %c0_71 = arith.constant 0 : index
    %68 = vector.load %arg4[%c0_69, %c0_70, %c0_71] : memref<1x16x128xf32, #tpu.memory_space<vmem>>, vector<1x16x128xf32>
    %69 = vector.shape_cast %68 : vector<1x16x128xf32> to vector<16x128xf32>
    %70 = vector.shape_cast %67 : vector<16x128xf32> to vector<1x16x128xf32>
    tpu.vector_store %arg4[%c0_69, %c0_70, %c0_71], %70 {strides = array<i32>} : memref<1x16x128xf32, #tpu.memory_space<vmem>>, vector<1x16x128xf32>,
    return
  }
  func.func @transform_0(%arg0: i32) -> (i32, i32, i32, i32) {
    %c0_i32 = arith.constant 0 : i32
    %c0_i32_0 = arith.constant 0 : i32
    %c0_i32_1 = arith.constant 0 : i32
    %c0_i32_2 = arith.constant 0 : i32
    return %arg0, %c0_i32, %c0_i32_0, %c0_i32_1 : i32, i32, i32, i32
  }
  func.func @transform_1(%arg0: i32) -> (i32, i32, i32) {
    %c0_i32 = arith.constant 0 : i32
    %c0_i32_0 = arith.constant 0 : i32
    %c0_i32_1 = arith.constant 0 : i32
    %c0_i32_2 = arith.constant 0 : i32
    return %c0_i32, %c0_i32_0, %c0_i32_1 : i32, i32, i32
  }
  func.func @transform_2(%arg0: i32) -> (i32, i32) {
    %c0_i32 = arith.constant 0 : i32
    %c0_i32_0 = arith.constant 0 : i32
    %c0_i32_1 = arith.constant 0 : i32
    return %c0_i32, %c0_i32_0 : i32, i32
  }
  func.func @transform_3(%arg0: i32) -> (i32, i32, i32) {
    %c0_i32 = arith.constant 0 : i32
    %c0_i32_0 = arith.constant 0 : i32
    %c0_i32_1 = arith.constant 0 : i32
    return %arg0, %c0_i32, %c0_i32_0 : i32, i32, i32
  }
}

</mosaic_0001>

<bundles_post_ra>
// kernel: lsdf_encoder_forward.3
= control target key start
LH: loop header
LB: loop body
LE: loop exit
PB: predicated region body
PF: predicated region fallthrough
CT: control target
= control target key end

     0   :  { %s415_s12 = smov 0   ;;  %s475_s0 = inlined_call_operand.vmem [shape: f32[2,4,1,128], index: 0, kind: input, shape index: {}]   ;;  %s476_s1 = inlined_call_operand.vmem [shape: f32[9,8,1], index: 1, kind: input, shape index: {}]   ;;  %s477_s2 = inlined_call_operand.vmem [shape: f32[8,1], index: 2, kind: input, shape index: {}]   ;;  %s478_s3 = inlined_call_operand.vmem [shape: f32[2,8,128], index: 3, kind: output, shape index: {}]  }
   0x1 LB: > { %s344_s13 = sadd.s32 4294967295, %s389_s12   ;;  %p348_p0 = scmp.ge.s32.totalorder %s389_s12, 1  ;;  %s389_s12 = sphi %s415_s12, %s13_s12  }
   0x2   : > { %p136_p1 = scmp.lt.s32.totalorder %s389_s12, 3 }
   0x4   : > { %p137_p2 = pnand %p348_p0, %p136_p1 }
   0x5   : > { %p158_p3 = scmp.lt.s32.totalorder (!%p137_p2), %s344_s13, 1  ;;  %s392_s22 = smov (!%p137_p2), 127  }
   0x6   : > { %140 = sbr.rel (%p137_p2) target bundleno = 172 (0xac), region = 32  ;;  %s393_s29 = smov (!%p137_p2), 119  }
   0x7   : > { %s394_s11 = smov (!%p137_p2), 118  }
   0xb   : > { %v167_v0 = vld [vmem:[%s476_s1] sm:$0xff]  ;;  %v355_v1 = vld [vmem:[%s476_s1 + $0x18] sm:$0xff]  ;;  %v391_v2 = vmov 0   ;;  %s480_s13 = smov (!%p158_p3, %s344_s13), 1  ;;  %v352_v4 = vld [vmem:[%s476_s1 + $0x8] sm:$0xff] }
   0xc   : > { %376 = vset.pattern.permute.xlu0 %v391_v2  ;;  %378 = vset.pattern.permute.xlu2 %v391_v2  ;;  %s349_s18 = sshll.u32 %s480_s13, 2  ;;  %v357_v5 = vld [vmem:[%s476_s1 + $0x20] sm:$0xff]  ;;  %v353_v6 = vld [vmem:[%s476_s1 + $0x10] sm:$0xff]  ;;  %v358_v8 = vld [vmem:[%s476_s1 + $0x28] sm:$0xff]  ;;  %s350_s16 = sshll.u32 %s480_s13, 3 }
   0xd   : > { %170 = vperm.xlu0 %376, %v167_v0   ;;  %210 = vperm.xlu2 %378, %v355_v1   ;;  %s435_s21 = scalar_lea.vmem %s475_s0, %s349_s18  ;;  %v359_v9 = vld [vmem:[%s476_s1 + $0x30] sm:$0xff]  ;;  %v360_v10 = vld [vmem:[%s476_s1 + $0x38] sm:$0xff]  ;;  %v280_v12 = vld [vmem:[%s477_s2] sm:$0xff]  ;;  %s165_s19 = scalar_lea.vmem %s478_s3, %s350_s16 }
   0xe   : > { %377 = vset.pattern.permute.xlu1 %v391_v2  ;;  %v166_v3 = vld [vmem:[%s435_s21] sm:$0x1]  ;;  %v354_v7 = vld [vmem:[%s435_s21 + $0x2] sm:$0x1]  ;;  %v351_v11 = vld [vmem:[%s435_s21 + $0x1] sm:$0x1] }
   0xf   : > { %192 = vrot.lane.b32.xlu1 %v166_v3, %s392_s22  ;;  %v361_v13 = vld [vmem:[%s476_s1 + $0x40] sm:$0xff] }
  0x10   : > { %v382_v19 = vld [vmem:[%s435_s21 + $0x1] ss:$0 sm:$0xff]  ;;  %v381_v21 = vld [vmem:[%s435_s21] ss:$0 sm:$0xff]  ;;  %v379_v27 = vld [vmem:[%s435_s21 + $0x2] ss:$0 sm:$0xff] }
  0x11   : > { %v380_v33 = vld [vmem:[%s435_s21 + $0x3] ss:$0 sm:$0xff] }
  0x15   : > { %184 = vperm.xlu0 %376, %v352_v4   ;;  %224 = vperm.xlu2 %378, %v357_v5  }
  0x17   : > { %198 = vperm.xlu1 %377, %v353_v6  }
  0x1d   : > { %232 = vrot.lane.b32.xlu0 %v354_v7, %s392_s22  ;;  %244 = vrot.lane.b32.xlu2 %v166_v3, %s393_s29 }
  0x1f   : > { %238 = vperm.xlu1 %377, %v358_v8  }
  0x25   : > { %250 = vperm.xlu0 %376, %v359_v9   ;;  %262 = vperm.xlu2 %378, %v360_v10  }
  0x27   : > { %256 = vrot.lane.b32.xlu1 %v351_v11, %s393_s29 }
  0x2d   : > { %283 = vperm.xlu2 %378, %v280_v12   ;;  %268 = vrot.lane.b32.xlu0 %v166_v3, %s394_s11 }
  0x2f   : > { %274 = vperm.xlu1 %377, %v361_v13  }
  0x67   : > { %v211_v15 = vpop.permute.xlu2 %210 }
  0x68   : > { %v216_v32 = vmul.f32 %v379_v27, %v211_v15 }
  0x6f   : > { %v225_v18 = vpop.permute.xlu2 %224 }
  0x70   : > { %v230_v37 = vmul.f32 %v380_v33, %v225_v18 }
  0x77   : > { %v245_v29 = vpop.permute.xlu2 %244 }
  0x78   : > { %v253_v38 = vperm.slane %v245_v29, 0 }
  0x7f   : > { %v171_v14 = vpop.permute.xlu0 %170  ;;  %v263_v43 = vpop.permute.xlu2 %262 }
  0x80   : > { %v176_v25 = vmul.f32 %v381_v21, %v171_v14 }
  0x81   : > { %v193_v16 = vpop.permute.xlu1 %192 }
  0x82   : > { %v201_v22 = vperm.slane %v193_v16, 0 }
  0x87   : > { %v185_v17 = vpop.permute.xlu0 %184  ;;  %v284_v54 = vpop.permute.xlu2 %283 }
  0x88   : > { %v190_v23 = vmul.f32 %v382_v19, %v185_v17 }
  0x89   : > { %v199_v20 = vpop.permute.xlu1 %198 }
  0x8a   : > { %v202_v26 = vmul.f32 %v201_v22, %v199_v20  ;;  %v191_v28 = vadd.f32 %v190_v23, %v176_v25 }
  0x8c   : > { %v203_v31 = vadd.f32 %v202_v26, %v191_v28 }
  0x8e   : > { %v217_v36 = vadd.f32 %v216_v32, %v203_v31 }
  0x8f   : > { %v233_v24 = vpop.permute.xlu0 %232 }
  0x90   : > { %v241_v34 = vperm.slane %v233_v24, 0  ;;  %v231_v41 = vadd.f32 %v230_v37, %v217_v36 }
  0x91   : > { %v239_v30 = vpop.permute.xlu1 %238 }
  0x92   : > { %v242_v39 = vmul.f32 %v241_v34, %v239_v30 }
  0x94   : > { %v243_v44 = vadd.f32 %v242_v39, %v231_v41 }
  0x97   : > { %v251_v35 = vpop.permute.xlu0 %250 }
  0x98   : > { %v254_v45 = vmul.f32 %v253_v38, %v251_v35 }
  0x99   : > { %v257_v40 = vpop.permute.xlu1 %256 }
  0x9a   : > { %v265_v42 = vperm.slane %v257_v40, 0  ;;  %v255_v49 = vadd.f32 %v254_v45, %v243_v44 }
  0x9c   : > { %v266_v47 = vmul.f32 %v265_v42, %v263_v43 }
  0x9e   : > { %v267_v51 = vadd.f32 %v266_v47, %v255_v49 }
  0x9f   : > { %v269_v46 = vpop.permute.xlu0 %268 }
  0xa0   : > { %v277_v48 = vperm.slane %v269_v46, 0 }
  0xa1   : > { %v275_v50 = vpop.permute.xlu1 %274 }
  0xa2   : > { %v278_v52 = vmul.f32 %v277_v48, %v275_v50 }
  0xa4   : > { %v279_v53 = vadd.f32 %v278_v52, %v267_v51 }
  0xa6   : > { %v286_v55 = vadd.f32 %v284_v54, %v279_v53 }
  0xa8   : > { %vm287_vm0 = vcmp.ge.f32.partialorder %v286_v55, 0.0  ;;  %v288_v56 = vmul.f32 0.2, %v286_v55 }
  0xaa   : > { %v289_v57 = vsel %vm287_vm0, %v286_v55, %v288_v56 }
  0xab   : > { %290 = vst [vmem:[%s165_s19] sm:$0xff] %v289_v57 }
  0xac PF: > { %s13_s12 = sadd.s32 1, %s389_s12  }
  0xad   : > { %p10_p4 = scmp.ge.s32.totalorder %s13_s12, 4  }
  0xaf   :  { %12 = sbr.rel (!%p10_p4) target bundleno = 1 (0x1), region = 73 }

// kernel: lsdf_encoder_forward.4
= control target key start
LH: loop header
LB: loop body
LE: loop exit
PB: predicated region body
PF: predicated region fallthrough
CT: control target
= control target key end

     0   :  { %s669_s12 = smov 0   ;;  %s768_s0 = inlined_call_operand.vmem [shape: f32[2,4,8,128], index: 0, kind: input, shape index: {}]   ;;  %s769_s1 = inlined_call_operand.vmem [shape: f32[9,16,8], index: 1, kind: input, shape index: {}]   ;;  %s770_s2 = inlined_call_operand.vmem [shape: f32[16,1], index: 2, kind: input, shape index: {}]   ;;  %s771_s3 = inlined_call_operand.vmem [shape: f32[2,16,128], index: 3, kind: output, shape index: {}]  }
   0x1 LB: > { %s567_s13 = sadd.s32 4294967295, %s643_s12   ;;  %p571_p0 = scmp.ge.s32.totalorder %s643_s12, 1  ;;  %s643_s12 = sphi %s669_s12, %s13_s12  }
   0x2   : > { %p137_p1 = scmp.lt.s32.totalorder %s643_s12, 3 }
   0x4   : > { %p138_p2 = pnand %p571_p0, %p137_p1 }
   0x5   : > { %p161_p3 = scmp.lt.s32.totalorder (!%p138_p2), %s567_s13, 1  ;;  %s645_s20 = smov (!%p138_p2), 127  }
   0x6   : > { %141 = sbr.rel (%p138_p2) target bundleno = 299 (0x12b), region = 32  ;;  %s646_s23 = smov (!%p138_p2), 123  }
   0x7   : > { %s647_s24 = smov (!%p138_p2), 122  }
   0xb   : > { %s773_s13 = smov (!%p161_p3, %s567_s13), 1  ;;  %v578_v2 = vld [vmem:[%s769_s1 + $0x18] sm:$0xff]  ;;  %vm179_vm0 = vcmask 64512   ;;  %v172_v5 = vld [vmem:[%s769_s1] sm:$0xff]  ;;  %v173_v6 = vld [vmem:[%s769_s1 + $0x8] sm:$0xff]  ;;  %v648_v13 = vmov 0  }
   0xc   : > { %s615_s14 = sshll.u32 %s773_s13, 5  ;;  %v577_v7 = vld [vmem:[%s769_s1 + $0x10] sm:$0xff]  ;;  %v589_v10 = vld [vmem:[%s769_s1 + $0x38] sm:$0xff]  ;;  %v593_v11 = vld [vmem:[%s769_s1 + $0x40] sm:$0xff]  ;;  %635 = vset.pattern.permute.xlu2 %v648_v13  ;;  %636 = vset.pattern.permute.xlu0 %v648_v13  ;;  %s616_s9 = sshll.u32 %s773_s13, 4 }
   0xd   : > { %s165_s17 = scalar_lea.vmem %s768_s0, %s615_s14  ;;  %v588_v8 = vld [vmem:[%s769_s1 + $0x30] sm:$0xff]  ;;  %v594_v12 = vld [vmem:[%s769_s1 + $0x48] sm:$0xff]  ;;  %v490_v14 = vld [vmem:[%s770_s2] sm:$0xff]  ;;  %s170_s14 = scalar_lea.vmem %s771_s3, %s616_s9 }
   0xe   : > { %v171_v0 = vld [vmem:[%s165_s17] sm:$0xff]  ;;  %v587_v1 = vld [vmem:[%s165_s17 + $0x10] sm:$0xff]  ;;  %v576_v3 = vld [vmem:[%s165_s17 + $0x8] sm:$0xff]  ;;  %494 = vperm.xlu2 %635, %v490_v14  }
   0xf   : > { %238 = vrot.lane.b32.xlu0 %v171_v0, %s645_s20  ;;  %346 = vrot.lane.b32.xlu1 %v587_v1, %s645_s20  ;;  %v630_v4 = vpack.i.bf16 %v576_v3, %v171_v0  ;;  %v592_v9 = vld [vmem:[%s165_s17 + $0x18] sm:$0xff]  ;;  %v583_v15 = vld [vmem:[%s769_s1 + $0x20] sm:$0xff] }
  0x10   : > { %617 = vmatpush.msra.mxu1 %v576_v3  ;;  %201 = vmatpush.msra.mxu0 %v576_v3  ;;  %v597_v16 = vld [vmem:[%s769_s1 + $0x50] sm:$0xff]  ;;  %v491_v19 = vld [vmem:[%s770_s2 + $0x8] sm:$0xff]  ;;  %v598_v21 = vld [vmem:[%s769_s1 + $0x58] sm:$0xff] }
  0x11   : > { %580 = vmatmul.msk.f32.vlgmr.msra.gmra.mxu1 %vm179_vm0, %v578_v2  ;;  %300 = vmatpush.msra.mxu3 %v587_v1  ;;  %v584_v20 = vld [vmem:[%s769_s1 + $0x28] sm:$0xff]  ;;  %v605_v26 = vld [vmem:[%s769_s1 + $0x70] sm:$0xff]  ;;  %v609_v27 = vld [vmem:[%s769_s1 + $0x80] sm:$0xff] }
  0x12   : > { %230 = vmatpush.msrb.mxu1 %v171_v0  ;;  %579 = vmatmul.msk.f32.vlgmr.msra.gmra.mxu0 %vm179_vm0, %v577_v7  ;;  %v601_v28 = vld [vmem:[%s769_s1 + $0x60] sm:$0xff]  ;;  %v606_v29 = vld [vmem:[%s769_s1 + $0x78] sm:$0xff]  ;;  %v610_v30 = vld [vmem:[%s769_s1 + $0x88] sm:$0xff] }
  0x13   : > { %590 = vmatmul.msk.f32.vlgmr.msra.gmra.mxu3 %vm179_vm0, %v588_v8  ;;  %336 = vmatpush.msrb.mxu0 %v592_v9  ;;  %v602_v31 = vld [vmem:[%s769_s1 + $0x68] sm:$0xff] }
  0x16   : > { %499 = vperm.xlu2 %635, %v491_v19  }
  0x17   : > { %631 = vrot.lane.b32.xlu0 %v630_v4, %s646_s23  ;;  %454 = vrot.lane.b32.xlu1 %v171_v0, %s647_s24 }
  0x19   : > { %581 = vmatmul.msk.f32.vlgmr.msrb.gmra.mxu1 %vm179_vm0, %v172_v5 }
  0x1a   : > { %595 = vmatmul.msk.f32.vlgmr.msrb.gmra.mxu0 %vm179_vm0, %v593_v11 }
  0x1b   : > { %591 = vmatmul.msk.f32.gmra.mxu3 %vm179_vm0, %v589_v10 }
  0x21   : > { %582 = vmatmul.msk.f32.gmra.mxu1 %vm179_vm0, %v173_v6 }
  0x22   : > { %596 = vmatmul.msk.f32.gmra.mxu0 %vm179_vm0, %v594_v12 }
  0x68   : > { %v495_v58 = vpop.permute.xlu2 %494 }
  0x70   : > { %v500_v6 = vpop.permute.xlu2 %499 }
  0x81   : > { %v239_v17 = vpop.permute.xlu0 %238  ;;  %v347_v18 = vpop.permute.xlu1 %346 }
  0x82   : > { %264 = vmatpush.msra.mxu2 %v239_v17  ;;  %372 = vmatpush.msra.mxu1 %v347_v18 }
  0x83   : > { %585 = vmatmul.msk.f32.vlgmr.msra.gmra.mxu2 %vm179_vm0, %v583_v15  ;;  %599 = vmatmul.msk.f32.vlgmr.msra.gmra.mxu1 %vm179_vm0, %v597_v16 }
  0x89   : > { %v632_v22 = vpop.permute.xlu0 %631  ;;  %v455_v23 = vpop.permute.xlu1 %454 }
  0x8a   : > { %v634_v24 = vunpack.i.h.bf16 %v632_v22  ;;  %v633_v25 = vunpack.i.l.bf16 %v632_v22  ;;  %480 = vmatpush.msra.mxu0 %v455_v23 }
  0x8b   : > { %586 = vmatmul.msk.f32.gmra.mxu2 %vm179_vm0, %v584_v20  ;;  %600 = vmatmul.msk.f32.gmra.mxu1 %vm179_vm0, %v598_v21 }
  0x8c   : > { %408 = vmatpush.msrb.mxu2 %v633_v25  ;;  %444 = vmatpush.msrb.mxu3 %v634_v24 }
  0x8d   : > { %607 = vmatmul.msk.f32.vlgmr.msrb.gmra.mxu3 %vm179_vm0, %v605_v26  ;;  %611 = vmatmul.msk.f32.vlgmr.msra.gmra.mxu0 %vm179_vm0, %v609_v27 }
  0x8e   : > { %v206_v32 = vpop.f32.mrf.mxu1 }
  0x8f   : > { %v203_v33 = vpop.f32.mrf.mxu0 }
  0x93   : > { %603 = vmatmul.msk.f32.vlgmr.msrb.gmra.mxu2 %vm179_vm0, %v601_v28 }
  0x95   : > { %608 = vmatmul.msk.f32.gmra.mxu3 %vm179_vm0, %v606_v29  ;;  %612 = vmatmul.msk.f32.gmra.mxu0 %vm179_vm0, %v610_v30 }
  0x96   : > { %v232_v34 = vpop.f32.mrf.mxu1  ;;  %v302_v35 = vpop.f32.mrf.mxu3 }
  0x97   : > { %v338_v36 = vpop.f32.mrf.mxu0  ;;  %v233_v38 = vadd.f32 %v232_v34, %v203_v33 }
  0x9b   : > { %604 = vmatmul.msk.f32.gmra.mxu2 %vm179_vm0, %v602_v31 }
  0x9e   : > { %v235_v39 = vpop.f32.mrf.mxu1  ;;  %v305_v41 = vpop.f32.mrf.mxu3 }
  0x9f   : > { %v341_v42 = vpop.f32.mrf.mxu0  ;;  %v236_v45 = vadd.f32 %v235_v39, %v206_v32 }
 0x100   : > { %v374_v46 = vpop.f32.mrf.mxu1 }
 0x106   : > { %v266_v37 = vpop.f32.mrf.mxu2 }
 0x107   : > { %v272_v40 = vadd.f32 %v266_v37, %v233_v38 }
 0x108   : > { %v377_v57 = vpop.f32.mrf.mxu1 }
 0x109   : > { %v308_v43 = vadd.f32 %v302_v35, %v272_v40 }
 0x10a   : > { %v482_v53 = vpop.f32.mrf.mxu0 }
 0x10b   : > { %v344_v47 = vadd.f32 %v338_v36, %v308_v43 }
 0x10d   : > { %v380_v50 = vadd.f32 %v374_v46, %v344_v47 }
 0x10e   : > { %v269_v44 = vpop.f32.mrf.mxu2 }
 0x10f   : > { %v273_v48 = vadd.f32 %v269_v44, %v236_v45 }
 0x110   : > { %v446_v49 = vpop.f32.mrf.mxu3 }
 0x111   : > { %v309_v51 = vadd.f32 %v305_v41, %v273_v48 }
 0x112   : > { %v485_v2 = vpop.f32.mrf.mxu0 }
 0x113   : > { %v345_v55 = vadd.f32 %v341_v42, %v309_v51 }
 0x115   : > { %v381_v60 = vadd.f32 %v377_v57, %v345_v55 }
 0x116   : > { %v410_v52 = vpop.f32.mrf.mxu2 }
 0x117   : > { %v416_v54 = vadd.f32 %v410_v52, %v380_v50 }
 0x118   : > { %v449_v63 = vpop.f32.mrf.mxu3 }
 0x119   : > { %v452_v56 = vadd.f32 %v446_v49, %v416_v54 }
 0x11b   : > { %v488_v59 = vadd.f32 %v482_v53, %v452_v56 }
 0x11d   : > { %v502_v61 = vadd.f32 %v495_v58, %v488_v59 }
 0x11e   : > { %v413_v62 = vpop.f32.mrf.mxu2 }
 0x11f   : > { %vm504_vm1 = vcmp.ge.f32.partialorder %v502_v61, 0.0  ;;  %v506_v0 = vmul.f32 0.2, %v502_v61  ;;  %v417_v1 = vadd.f32 %v413_v62, %v381_v60 }
 0x121   : > { %v508_v3 = vsel %vm504_vm1, %v502_v61, %v506_v0  ;;  %v453_v4 = vadd.f32 %v449_v63, %v417_v1 }
 0x122   : > { %510 = vst [vmem:[%s170_s14] sm:$0xff] %v508_v3 }
 0x123   : > { %v489_v5 = vadd.f32 %v485_v2, %v453_v4 }
 0x125   : > { %v503_v7 = vadd.f32 %v500_v6, %v489_v5 }
 0x127   : > { %vm505_vm2 = vcmp.ge.f32.partialorder %v503_v7, 0.0  ;;  %v507_v8 = vmul.f32 0.2, %v503_v7 }
 0x129   : > { %v509_v9 = vsel %vm505_vm2, %v503_v7, %v507_v8 }
 0x12a   : > { %511 = vst [vmem:[%s170_s14 + $0x8] sm:$0xff] %v509_v9 }
 0x12b PF: > { %s13_s12 = sadd.s32 1, %s643_s12  }
 0x12c   : > { %p10_p4 = scmp.ge.s32.totalorder %s13_s12, 4  }
 0x12e   :  { %12 = sbr.rel (!%p10_p4) target bundleno = 1 (0x1), region = 73 }

// kernel: lsdf_encoder_forward.5
= control target key start
LH: loop header
LB: loop body
LE: loop exit
PB: predicated region body
PF: predicated region fallthrough
CT: control target
= control target key end

     0   :  { %s707_s12 = smov 0   ;;  %s816_s0 = inlined_call_operand.vmem [shape: f32[2,4,16,128], index: 0, kind: input, shape index: {}]   ;;  %s817_s1 = inlined_call_operand.vmem [shape: f32[9,16,16], index: 1, kind: input, shape index: {}]   ;;  %s818_s2 = inlined_call_operand.vmem [shape: f32[16,1], index: 2, kind: input, shape index: {}]   ;;  %s819_s3 = inlined_call_operand.vmem [shape: f32[2,16,128], index: 3, kind: output, shape index: {}]  }
   0x1 LB: > { %s581_s13 = sadd.s32 4294967295, %s681_s12   ;;  %p585_p0 = scmp.ge.s32.totalorder %s681_s12, 1  ;;  %s681_s12 = sphi %s707_s12, %s13_s12  }
   0x2   : > { %p137_p1 = scmp.lt.s32.totalorder %s681_s12, 3 }
   0x4   : > { %p138_p2 = pnand %p585_p0, %p137_p1 }
   0x5   : > { %p161_p3 = scmp.lt.s32.totalorder (!%p138_p2), %s581_s13, 1  ;;  %s683_s20 = smov (!%p138_p2), 127  }
   0x6   : > { %141 = sbr.rel (%p138_p2) target bundleno = 305 (0x131), region = 32  ;;  %s684_s21 = smov (!%p138_p2), 124  }
   0x7   : > { %s685_s22 = smov (!%p138_p2), 125  }
   0xb   : > { %s821_s13 = smov (!%p161_p3, %s581_s13), 1  ;;  %v593_v7 = vld [vmem:[%s817_s1 + $0x18] sm:$0xff]  ;;  %vm181_vm0 = vcmask 130048   ;;  %v173_v10 = vld [vmem:[%s817_s1] sm:$0xff]  ;;  %v174_v11 = vld [vmem:[%s817_s1 + $0x8] sm:$0xff]  ;;  %v686_v23 = vmov 0  }
   0xc   : > { %s632_s14 = sshll.u32 %s821_s13, 6  ;;  %v592_v12 = vld [vmem:[%s817_s1 + $0x10] sm:$0xff]  ;;  %v605_v16 = vld [vmem:[%s817_s1 + $0x38] sm:$0xff]  ;;  %v610_v17 = vld [vmem:[%s817_s1 + $0x40] sm:$0xff]  ;;  %674 = vset.pattern.permute.xlu0 %v686_v23  ;;  %673 = vset.pattern.permute.xlu2 %v686_v23  ;;  %s633_s9 = sshll.u32 %s821_s13, 4 }
   0xd   : > { %s721_s17 = scalar_lea.vmem %s816_s0, %s632_s14  ;;  %v604_v13 = vld [vmem:[%s817_s1 + $0x30] sm:$0xff]  ;;  %v611_v21 = vld [vmem:[%s817_s1 + $0x48] sm:$0xff]  ;;  %v626_v22 = vld [vmem:[%s817_s1 + $0x80] sm:$0xff]  ;;  %s170_s14 = scalar_lea.vmem %s819_s3, %s633_s9 }
   0xe   : > { %v171_v0 = vld [vmem:[%s721_s17] sm:$0xff]  ;;  %v172_v1 = vld [vmem:[%s721_s17 + $0x8] sm:$0xff]  ;;  %v590_v2 = vld [vmem:[%s721_s17 + $0x10] sm:$0xff] }
   0xf   : > { %v648_v3 = vpack.i.bf16 %v171_v0, %v172_v1  ;;  %v591_v4 = vld [vmem:[%s721_s17 + $0x18] sm:$0xff]  ;;  %v603_v5 = vld [vmem:[%s721_s17 + $0x28] sm:$0xff]  ;;  %v602_v8 = vld [vmem:[%s721_s17 + $0x20] sm:$0xff] }
  0x10   : > { %v658_v6 = vpack.i.bf16 %v590_v2, %v591_v4  ;;  %634 = vmatpush.msra.mxu1 %v591_v4  ;;  %304 = vmatpush.msra.mxu3 %v603_v5  ;;  %v663_v9 = vpack.i.bf16 %v602_v8, %v603_v5  ;;  %v609_v14 = vld [vmem:[%s721_s17 + $0x38] sm:$0xff]  ;;  %v608_v15 = vld [vmem:[%s721_s17 + $0x30] sm:$0xff]  ;;  %v505_v24 = vld [vmem:[%s818_s2 + $0x8] sm:$0xff] }
  0x11   : > { %649 = vrot.lane.b32.xlu0 %v648_v3, %s683_s20  ;;  %669 = vrot.lane.b32.xlu2 %v648_v3, %s684_s21  ;;  %v504_v25 = vld [vmem:[%s818_s2] sm:$0xff]  ;;  %v622_v33 = vld [vmem:[%s817_s1 + $0x70] sm:$0xff] }
  0x12   : > { %659 = vrot.lane.b32.xlu1 %v658_v6, %s685_s22  ;;  %635 = vmatpush.msra.mxu1 %v590_v2  ;;  %v598_v32 = vld [vmem:[%s817_s1 + $0x20] sm:$0xff]  ;;  %v627_v34 = vld [vmem:[%s817_s1 + $0x88] sm:$0xff]  ;;  %v614_v42 = vld [vmem:[%s817_s1 + $0x50] sm:$0xff] }
  0x13   : > { %595 = vmatmul.msk.f32.vlgmr.msra.gmra.mxu1 %vm181_vm0, %v593_v7  ;;  %305 = vmatpush.msra.mxu3 %v602_v8  ;;  %v599_v41 = vld [vmem:[%s817_s1 + $0x28] sm:$0xff]  ;;  %v623_v43 = vld [vmem:[%s817_s1 + $0x78] sm:$0xff]  ;;  %v618_v44 = vld [vmem:[%s817_s1 + $0x60] sm:$0xff] }
  0x14   : > { %231 = vmatpush.msrb.mxu1 %v172_v1  ;;  %202 = vmatpush.msra.mxu0 %v591_v4  ;;  %v615_v45 = vld [vmem:[%s817_s1 + $0x58] sm:$0xff]  ;;  %v619_v46 = vld [vmem:[%s817_s1 + $0x68] sm:$0xff] }
  0x15   : > { %606 = vmatmul.msk.f32.vlgmr.msra.gmra.mxu3 %vm181_vm0, %v604_v13 }
  0x16   : > { %232 = vmatpush.msrb.mxu1 %v171_v0  ;;  %203 = vmatpush.msra.mxu0 %v590_v2 }
  0x17   : > { %594 = vmatmul.msk.f32.vlgmr.msra.gmra.mxu0 %vm181_vm0, %v592_v12 }
  0x18   : > { %341 = vmatpush.msrb.mxu0 %v609_v14 }
  0x19   : > { %654 = vrot.lane.b32.xlu0 %v648_v3, %s685_s22  ;;  %508 = vperm.xlu2 %673, %v504_v25  }
  0x1a   : > { %664 = vrot.lane.b32.xlu1 %v663_v9, %s683_s20  ;;  %342 = vmatpush.msrb.mxu0 %v608_v15 }
  0x1b   : > { %596 = vmatmul.msk.f32.vlgmr.msrb.gmra.mxu1 %vm181_vm0, %v173_v10 }
  0x1d   : > { %607 = vmatmul.msk.f32.gmra.mxu3 %vm181_vm0, %v605_v16 }
  0x1f   : > { %612 = vmatmul.msk.f32.vlgmr.msrb.gmra.mxu0 %vm181_vm0, %v610_v17 }
  0x21   : > { %513 = vperm.xlu0 %674, %v505_v24  }
  0x23   : > { %597 = vmatmul.msk.f32.gmra.mxu1 %vm181_vm0, %v174_v11 }
  0x27   : > { %613 = vmatmul.msk.f32.gmra.mxu0 %vm181_vm0, %v611_v21 }
  0x6b   : > { %v670_v18 = vpop.permute.xlu2 %669 }
  0x6c   : > { %v672_v19 = vunpack.i.h.bf16 %v670_v18  ;;  %v671_v20 = vunpack.i.l.bf16 %v670_v18 }
  0x6e   : > { %493 = vmatpush.msra.mxu0 %v671_v20 }
  0x70   : > { %494 = vmatpush.msra.mxu0 %v672_v19 }
  0x71   : > { %628 = vmatmul.msk.f32.vlgmr.msra.gmra.mxu0 %vm181_vm0, %v626_v22 }
  0x73   : > { %v509_v9 = vpop.permute.xlu2 %508 }
  0x79   : > { %629 = vmatmul.msk.f32.gmra.mxu0 %vm181_vm0, %v627_v34 }
  0x83   : > { %v650_v26 = vpop.permute.xlu0 %649 }
  0x84   : > { %v660_v27 = vpop.permute.xlu1 %659  ;;  %v651_v28 = vunpack.i.l.bf16 %v650_v26  ;;  %v652_v31 = vunpack.i.h.bf16 %v650_v26 }
  0x85   : > { %v661_v29 = vunpack.i.l.bf16 %v660_v27  ;;  %v662_v30 = vunpack.i.h.bf16 %v660_v27 }
  0x86   : > { %267 = vmatpush.msra.mxu2 %v651_v28 }
  0x87   : > { %455 = vmatpush.msrb.mxu3 %v661_v29 }
  0x88   : > { %268 = vmatpush.msra.mxu2 %v652_v31 }
  0x89   : > { %600 = vmatmul.msk.f32.vlgmr.msra.gmra.mxu2 %vm181_vm0, %v598_v32  ;;  %456 = vmatpush.msrb.mxu3 %v662_v30 }
  0x8a   : > { %624 = vmatmul.msk.f32.vlgmr.msrb.gmra.mxu3 %vm181_vm0, %v622_v33 }
  0x8b   : > { %v655_v35 = vpop.permute.xlu0 %654 }
  0x8c   : > { %v665_v36 = vpop.permute.xlu1 %664  ;;  %v656_v37 = vunpack.i.l.bf16 %v655_v35  ;;  %v657_v38 = vunpack.i.h.bf16 %v655_v35 }
  0x8d   : > { %v667_v39 = vunpack.i.h.bf16 %v665_v36  ;;  %v666_v40 = vunpack.i.l.bf16 %v665_v36 }
  0x8e   : > { %417 = vmatpush.msrb.mxu2 %v656_v37 }
  0x8f   : > { %379 = vmatpush.msra.mxu1 %v666_v40 }
  0x90   : > { %418 = vmatpush.msrb.mxu2 %v657_v38  ;;  %v208_v47 = vpop.f32.mrf.mxu1 }
  0x91   : > { %601 = vmatmul.msk.f32.gmra.mxu2 %vm181_vm0, %v599_v41  ;;  %380 = vmatpush.msra.mxu1 %v667_v39 }
  0x92   : > { %616 = vmatmul.msk.f32.vlgmr.msra.gmra.mxu1 %vm181_vm0, %v614_v42  ;;  %625 = vmatmul.msk.f32.gmra.mxu3 %vm181_vm0, %v623_v43 }
  0x93   : > { %v514_v20 = vpop.permute.xlu0 %513 }
  0x94   : > { %v205_v48 = vpop.f32.mrf.mxu0 }
  0x98   : > { %v234_v49 = vpop.f32.mrf.mxu1  ;;  %v307_v50 = vpop.f32.mrf.mxu3 }
  0x99   : > { %620 = vmatmul.msk.f32.vlgmr.msrb.gmra.mxu2 %vm181_vm0, %v618_v44  ;;  %v235_v53 = vadd.f32 %v234_v49, %v205_v48 }
  0x9a   : > { %617 = vmatmul.msk.f32.gmra.mxu1 %vm181_vm0, %v615_v45 }
  0x9c   : > { %v344_v51 = vpop.f32.mrf.mxu0 }
  0xa0   : > { %v237_v54 = vpop.f32.mrf.mxu1  ;;  %v310_v56 = vpop.f32.mrf.mxu3 }
  0xa1   : > { %621 = vmatmul.msk.f32.gmra.mxu2 %vm181_vm0, %v619_v46  ;;  %v238_v60 = vadd.f32 %v237_v54, %v208_v47 }
  0xa4   : > { %v347_v57 = vpop.f32.mrf.mxu0 }
  0xee   : > { %v496_v4 = vpop.f32.mrf.mxu0 }
  0xf6   : > { %v499_v17 = vpop.f32.mrf.mxu0 }
 0x10c   : > { %v270_v52 = vpop.f32.mrf.mxu2 }
 0x10d   : > { %v276_v55 = vadd.f32 %v270_v52, %v235_v53  ;;  %v458_v0 = vpop.f32.mrf.mxu3 }
 0x10f   : > { %v313_v58 = vadd.f32 %v307_v50, %v276_v55  ;;  %v382_v61 = vpop.f32.mrf.mxu1 }
 0x111   : > { %v350_v62 = vadd.f32 %v344_v51, %v313_v58 }
 0x113   : > { %v388_v1 = vadd.f32 %v382_v61, %v350_v62 }
 0x114   : > { %v273_v59 = vpop.f32.mrf.mxu2 }
 0x115   : > { %v277_v63 = vadd.f32 %v273_v59, %v238_v60  ;;  %v461_v14 = vpop.f32.mrf.mxu3 }
 0x117   : > { %v314_v2 = vadd.f32 %v310_v56, %v277_v63  ;;  %v385_v8 = vpop.f32.mrf.mxu1 }
 0x119   : > { %v351_v6 = vadd.f32 %v347_v57, %v314_v2 }
 0x11b   : > { %v389_v11 = vadd.f32 %v385_v8, %v351_v6 }
 0x11c   : > { %v420_v3 = vpop.f32.mrf.mxu2 }
 0x11d   : > { %v426_v5 = vadd.f32 %v420_v3, %v388_v1 }
 0x11f   : > { %v464_v7 = vadd.f32 %v458_v0, %v426_v5 }
 0x121   : > { %v502_v10 = vadd.f32 %v496_v4, %v464_v7 }
 0x123   : > { %v516_v12 = vadd.f32 %v509_v9, %v502_v10 }
 0x124   : > { %v423_v13 = vpop.f32.mrf.mxu2 }
 0x125   : > { %vm518_vm1 = vcmp.ge.f32.partialorder %v516_v12, 0.0  ;;  %v520_v15 = vmul.f32 0.2, %v516_v12  ;;  %v427_v16 = vadd.f32 %v423_v13, %v389_v11 }
 0x127   : > { %v522_v18 = vsel %vm518_vm1, %v516_v12, %v520_v15  ;;  %v465_v19 = vadd.f32 %v461_v14, %v427_v16 }
 0x128   : > { %524 = vst [vmem:[%s170_s14] sm:$0xff] %v522_v18 }
 0x129   : > { %v503_v21 = vadd.f32 %v499_v17, %v465_v19 }
 0x12b   : > { %v517_v22 = vadd.f32 %v514_v20, %v503_v21 }
 0x12d   : > { %vm519_vm2 = vcmp.ge.f32.partialorder %v517_v22, 0.0  ;;  %v521_v23 = vmul.f32 0.2, %v517_v22 }
 0x12f   : > { %v523_v24 = vsel %vm519_vm2, %v517_v22, %v521_v23 }
 0x130   : > { %525 = vst [vmem:[%s170_s14 + $0x8] sm:$0xff] %v523_v24 }
 0x131 PF: > { %s13_s12 = sadd.s32 1, %s681_s12  }
 0x132   : > { %p10_p4 = scmp.ge.s32.totalorder %s13_s12, 4  }
 0x134   :  { %12 = sbr.rel (!%p10_p4) target bundleno = 1 (0x1), region = 73 }

</bundles_post_ra>
